<compile_context>
chip_gen: v6e
topology: v6e:2x2x1
jax: 0.10.0
libtpu: 0.0.40
codegen_flags: <defaults>
</compile_context>

<pallas_src>
import jax
import jax.numpy as jnp
from jax.experimental import pallas as pl
from jax.experimental.pallas import tpu as pltpu


def lstm_kernel(x_ref, wx_ref, wh_ref, b_ref, wp_ref, bp_ref, y_ref, gx_ref):
    # x_ref:  (T, B, 1)   time-major input column (input_dim == 1)
    # wx_ref: (1, 1, 4H)  fused input weights  [W_gx | 0.5*W_ix | 0.5*W_fx | 0.5*W_ox]^T
    # wh_ref: (H, 4H)     fused recurrent weights (same column order / scaling)
    # b_ref:  (1, 1, 4H)  fused biases (same column order / scaling)
    # wp_ref: (H, O), bp_ref: (1, O)   output projection
    # gx_ref: VMEM scratch (T, B, 4H)  precomputed input-side pre-activations
    T, B, _ = x_ref.shape
    H, _four_h = wh_ref.shape

    # --- Hoisted, recurrence-independent input affine for ALL steps (item 2).
    # (T, B, 1) * (1, 1, 4H) + (1, 1, 4H) -> (T, B, 4H); pure VPU work that
    # pipelines under the first recurrent matmul.
    gx_ref[...] = x_ref[...] * wx_ref[...] + b_ref[...]

    wh = wh_ref[...]                                   # (H, 4H), loaded once

    def step(t, carry):
        h, c = carry
        # One fused MXU matmul per step (item 1): (B, H) @ (H, 4H) -> (B, 4H).
        pre = gx_ref[t] + jnp.dot(h, wh, preferred_element_type=jnp.float32)
        # Single tanh over the whole fused block (item 3); i/f/o lanes were
        # pre-scaled by 0.5 so sigmoid(z) == 0.5 * (tanh(z/2) + 1).
        tt = jnp.tanh(pre)                             # (B, 4H)
        sig = 0.5 * tt + 0.5
        g = tt[:, 0:H]
        i = sig[:, H:2 * H]
        f = sig[:, 2 * H:3 * H]
        o = sig[:, 3 * H:4 * H]
        c = g * i + c * f
        h = jnp.tanh(c) * o
        return (h, c)

    h0 = jnp.zeros((B, H), jnp.float32)                # torch self.h == zeros
    c0 = jnp.zeros((B, H), jnp.float32)                # torch self.c == zeros
    h, _ = jax.lax.fori_loop(0, T, step, (h0, c0), unroll=True)   # item 5

    # --- Output projection + softmax over classes (last axis).
    p = jnp.dot(h, wp_ref[...], preferred_element_type=jnp.float32) + bp_ref[...]
    p = p - jnp.max(p, axis=-1, keepdims=True)
    e = jnp.exp(p)
    inv = pl.reciprocal(jnp.sum(e, axis=-1, keepdims=True), approx=True)  # item 6
    y_ref[...] = e * inv


def prepare_params(params):
    """One-time fuse / transpose / rescale of the torch-layout parameters.

    Done once per model (NOT per forward call) — removes the ~14 per-call XLA
    transpose ops the previous version launched (review item 4).
    Column order of the fused 4H axis: [g | i | f | o]; i/f/o columns carry the
    0.5 factor needed for the sigmoid-via-tanh trick.
    """
    f32 = jnp.float32
    W_x_all = jnp.concatenate(
        [params["W_gx"].T,
         0.5 * params["W_ix"].T,
         0.5 * params["W_fx"].T,
         0.5 * params["W_ox"].T], axis=1).astype(f32)          # (1, 4H)
    W_h_all = jnp.concatenate(
        [params["W_gh"].T,
         0.5 * params["W_ih"].T,
         0.5 * params["W_fh"].T,
         0.5 * params["W_oh"].T], axis=1).astype(f32)          # (H, 4H)
    b_all = jnp.concatenate(
        [params["b_g"].T,
         0.5 * params["b_i"].T,
         0.5 * params["b_f"].T,
         0.5 * params["b_o"].T], axis=1).astype(f32)           # (1, 4H)
    return {
        "W_x_all": W_x_all.reshape(1, 1, -1),                  # (1, 1, 4H)
        "W_h_all": W_h_all,                                    # (H, 4H)
        "b_all": b_all.reshape(1, 1, -1),                      # (1, 1, 4H)
        "W_p": params["W_ph"].T.astype(f32),                   # (H, O)
        "b_p": params["b_p"].T.astype(f32),                    # (1, O)
    }


def lstm_forward(x, packed):
    """x: (B, T) float32; packed: output of prepare_params."""
    B, T = x.shape
    H, four_h = packed["W_h_all"].shape
    O = packed["W_p"].shape[1]

    # Layout plumbing only (64 bytes at this size): time-major input column so
    # the in-kernel hoisted affine is a plain lane-broadcast, no in-kernel
    # transpose/reshape.
    x_tb1 = x.T.reshape(T, B, 1).astype(jnp.float32)

    vmem = pl.BlockSpec(memory_space=pltpu.MemorySpace.VMEM)
    return pl.pallas_call(
        lstm_kernel,
        out_shape=jax.ShapeDtypeStruct((B, O), jnp.float32),
        in_specs=[vmem] * 6,
        out_specs=vmem,
        scratch_shapes=[pltpu.VMEM((T, B, four_h), jnp.float32)],
    )(x_tb1, packed["W_x_all"], packed["W_h_all"], packed["b_all"],
      packed["W_p"], packed["b_p"])
    # TODO(synk): for large batch, add a grid over B with resident-weight
    # index_maps and dimension_semantics=("parallel",) (2 TCs on v7x); at B=2
    # a grid is pure overhead.


def lstm_reference(x, params):
    """Pure-JAX reference matching the torch forward exactly (H, B layout)."""
    B, T = x.shape
    H = params["W_gh"].shape[0]
    h = jnp.zeros((H, B), jnp.float32)
    c = jnp.zeros((H, B), jnp.float32)
    for t in range(T):
        x_t = x[:, t].reshape(1, -1)                 # (1, B)
        g = jnp.tanh(params["W_gx"] @ x_t + params["W_gh"] @ h + params["b_g"])
        i = jax.nn.sigmoid(params["W_ix"] @ x_t + params["W_ih"] @ h + params["b_i"])
        f = jax.nn.sigmoid(params["W_fx"] @ x_t + params["W_fh"] @ h + params["b_f"])
        o = jax.nn.sigmoid(params["W_ox"] @ x_t + params["W_oh"] @ h + params["b_o"])
        c = g * i + c * f
        h = jnp.tanh(c) * o
    p = (params["W_ph"] @ h + params["b_p"]).T       # (B, O)
    return jax.nn.softmax(p, axis=-1)


def init_params(key, input_dim, hidden_dim, output_dim):
    ks = jax.random.split(key, 9)
    f32 = jnp.float32
    return {
        "W_gx": jax.random.normal(ks[0], (hidden_dim, input_dim), f32),
        "W_gh": jax.random.normal(ks[1], (hidden_dim, hidden_dim), f32),
        "b_g": jnp.zeros((hidden_dim, 1), f32),
        "W_ix": jax.random.normal(ks[2], (hidden_dim, input_dim), f32),
        "W_ih": jax.random.normal(ks[3], (hidden_dim, hidden_dim), f32),
        "b_i": jnp.zeros((hidden_dim, 1), f32),
        "W_fx": jax.random.normal(ks[4], (hidden_dim, input_dim), f32),
        "W_fh": jax.random.normal(ks[5], (hidden_dim, hidden_dim), f32),
        "b_f": jnp.zeros((hidden_dim, 1), f32),
        "W_ox": jax.random.normal(ks[6], (hidden_dim, input_dim), f32),
        "W_oh": jax.random.normal(ks[7], (hidden_dim, hidden_dim), f32),
        "b_o": jax.random.normal(ks[8], (hidden_dim, 1), f32),   # randn in torch
        "W_ph": jax.random.normal(jax.random.fold_in(key, 100),
                                  (output_dim, hidden_dim), f32),
        "b_p": jnp.zeros((output_dim, 1), f32),
    }


if __name__ == "__main__":
    seq_length = 8
    input_dim = 1          # implied by x[:, t].view(1, -1) in the torch forward
    hidden_dim = 32        # 4*H = 128 -> the fused gate block fills one lane group
    output_dim = 10
    batch_size = 2

    key = jax.random.PRNGKey(0)
    k_param, k_x = jax.random.split(key)
    params = init_params(k_param, input_dim, hidden_dim, output_dim)
    x = jax.random.normal(k_x, (batch_size, seq_length), jnp.float32)

    packed = prepare_params(params)            # one-time parameter packing
    y = lstm_forward(x, packed)
    y = jax.block_until_ready(y)

    y_ref = lstm_reference(x, params)
    assert y.shape == (batch_size, output_dim)
    # sigmoid-via-tanh + approx reciprocal + MXU f32 decomposition => slightly
    # looser (still tight) tolerance than bitwise.
    assert jnp.allclose(y, y_ref, rtol=2e-3, atol=1e-4), "mismatch vs reference"

    print("KERNEL_OK")
</pallas_src>

<mosaic_0001>
module attributes {stable_mosaic.version = 11 : i64} {
  func.func @lstm_kernel(%arg0: memref<8x2x1xf32, #tpu.memory_space<vmem>>, %arg1: memref<1x1x128xf32, #tpu.memory_space<vmem>>, %arg2: memref<32x128xf32, #tpu.memory_space<vmem>>, %arg3: memref<1x1x128xf32, #tpu.memory_space<vmem>>, %arg4: memref<32x10xf32, #tpu.memory_space<vmem>>, %arg5: memref<1x10xf32, #tpu.memory_space<vmem>>, %arg6: memref<2x10xf32, #tpu.memory_space<vmem>>, %arg7: memref<8x2x128xf32, #tpu.memory_space<vmem>>) attributes {dimension_semantics = [], scalar_prefetch = 0 : i64, scratch_operands = 1 : i64, tpu.core_type = #tpu.core_type<tc>} {
    %c0 = arith.constant 0 : index
    %c0_0 = arith.constant 0 : index
    %c0_1 = arith.constant 0 : index
    %0 = vector.load %arg0[%c0, %c0_0, %c0_1] : memref<8x2x1xf32, #tpu.memory_space<vmem>>, vector<8x2x1xf32>
    %c0_2 = arith.constant 0 : index
    %c0_3 = arith.constant 0 : index
    %c0_4 = arith.constant 0 : index
    %1 = vector.load %arg1[%c0_2, %c0_3, %c0_4] : memref<1x1x128xf32, #tpu.memory_space<vmem>>, vector<1x1x128xf32>
    %2 = vector.broadcast %0 : vector<8x2x1xf32> to vector<8x2x128xf32>
    %3 = vector.broadcast %1 : vector<1x1x128xf32> to vector<8x2x128xf32>
    %4 = arith.mulf %2, %3 : vector<8x2x128xf32>
    %c0_5 = arith.constant 0 : index
    %c0_6 = arith.constant 0 : index
    %c0_7 = arith.constant 0 : index
    %5 = vector.load %arg3[%c0_5, %c0_6, %c0_7] : memref<1x1x128xf32, #tpu.memory_space<vmem>>, vector<1x1x128xf32>
    %6 = vector.broadcast %5 : vector<1x1x128xf32> to vector<8x2x128xf32>
    %7 = arith.addf %4, %6 : vector<8x2x128xf32>
    %c0_8 = arith.constant 0 : index
    %c0_9 = arith.constant 0 : index
    %c0_10 = arith.constant 0 : index
    %8 = vector.load %arg7[%c0_8, %c0_9, %c0_10] : memref<8x2x128xf32, #tpu.memory_space<vmem>>, vector<8x2x128xf32>
    tpu.vector_store %arg7[%c0_8, %c0_9, %c0_10], %7 {strides = array<i32>} : memref<8x2x128xf32, #tpu.memory_space<vmem>>, vector<8x2x128xf32>,
    %c0_11 = arith.constant 0 : index
    %c0_12 = arith.constant 0 : index
    %9 = vector.load %arg2[%c0_11, %c0_12] : memref<32x128xf32, #tpu.memory_space<vmem>>, vector<32x128xf32>
    %cst = arith.constant 0.000000e+00 : f32
    %10 = vector.broadcast %cst : f32 to vector<2x32xf32>
    %cst_13 = arith.constant 0.000000e+00 : f32
    %11 = vector.broadcast %cst_13 : f32 to vector<2x32xf32>
    %c0_i32 = arith.constant 0 : i32
    %12 = arith.index_cast %c0_i32 : i32 to index
    %c0_14 = arith.constant 0 : index
    %c0_15 = arith.constant 0 : index
    %13 = vector.load %arg7[%12, %c0_14, %c0_15] : memref<8x2x128xf32, #tpu.memory_space<vmem>>, vector<1x2x128xf32>
    %14 = vector.shape_cast %13 : vector<1x2x128xf32> to vector<2x128xf32>
    %cst_16 = arith.constant dense<0.000000e+00> : vector<2x128xf32>
    %15 = tpu.matmul %10, %9, %cst_16 {dimension_numbers = #tpu.dot_dimension_numbers<[1], [0], [0], [1], [0, 0, 1, 1], [], []>} : vector<2x32xf32>, vector<32x128xf32>, vector<2x128xf32> -> vector<2x128xf32>
    %16 = arith.addf %14, %15 : vector<2x128xf32>
    %17 = math.tanh %16 : vector<2x128xf32>
    %cst_17 = arith.constant 5.000000e-01 : f32
    %18 = vector.broadcast %cst_17 : f32 to vector<2x128xf32>
    %19 = arith.mulf %18, %17 : vector<2x128xf32>
    %cst_18 = arith.constant 5.000000e-01 : f32
    %20 = vector.broadcast %cst_18 : f32 to vector<2x128xf32>
    %21 = arith.addf %19, %20 : vector<2x128xf32>
    %22 = vector.extract_strided_slice %17 {offsets = [0, 0], sizes = [2, 32], strides = [1, 1]} : vector<2x128xf32> to vector<2x32xf32>
    %23 = vector.extract_strided_slice %21 {offsets = [0, 32], sizes = [2, 32], strides = [1, 1]} : vector<2x128xf32> to vector<2x32xf32>
    %24 = vector.extract_strided_slice %21 {offsets = [0, 64], sizes = [2, 32], strides = [1, 1]} : vector<2x128xf32> to vector<2x32xf32>
    %25 = vector.extract_strided_slice %21 {offsets = [0, 96], sizes = [2, 32], strides = [1, 1]} : vector<2x128xf32> to vector<2x32xf32>
    %26 = arith.mulf %22, %23 : vector<2x32xf32>
    %27 = arith.mulf %11, %24 : vector<2x32xf32>
    %28 = arith.addf %26, %27 : vector<2x32xf32>
    %29 = math.tanh %28 : vector<2x32xf32>
    %30 = arith.mulf %29, %25 : vector<2x32xf32>
    %c1_i32 = arith.constant 1 : i32
    %31 = arith.index_cast %c1_i32 : i32 to index
    %c0_19 = arith.constant 0 : index
    %c0_20 = arith.constant 0 : index
    %32 = vector.load %arg7[%31, %c0_19, %c0_20] : memref<8x2x128xf32, #tpu.memory_space<vmem>>, vector<1x2x128xf32>
    %33 = vector.shape_cast %32 : vector<1x2x128xf32> to vector<2x128xf32>
    %cst_21 = arith.constant dense<0.000000e+00> : vector<2x128xf32>
    %34 = tpu.matmul %30, %9, %cst_21 {dimension_numbers = #tpu.dot_dimension_numbers<[1], [0], [0], [1], [0, 0, 1, 1], [], []>} : vector<2x32xf32>, vector<32x128xf32>, vector<2x128xf32> -> vector<2x128xf32>
    %35 = arith.addf %33, %34 : vector<2x128xf32>
    %36 = math.tanh %35 : vector<2x128xf32>
    %cst_22 = arith.constant 5.000000e-01 : f32
    %37 = vector.broadcast %cst_22 : f32 to vector<2x128xf32>
    %38 = arith.mulf %37, %36 : vector<2x128xf32>
    %cst_23 = arith.constant 5.000000e-01 : f32
    %39 = vector.broadcast %cst_23 : f32 to vector<2x128xf32>
    %40 = arith.addf %38, %39 : vector<2x128xf32>
    %41 = vector.extract_strided_slice %36 {offsets = [0, 0], sizes = [2, 32], strides = [1, 1]} : vector<2x128xf32> to vector<2x32xf32>
    %42 = vector.extract_strided_slice %40 {offsets = [0, 32], sizes = [2, 32], strides = [1, 1]} : vector<2x128xf32> to vector<2x32xf32>
    %43 = vector.extract_strided_slice %40 {offsets = [0, 64], sizes = [2, 32], strides = [1, 1]} : vector<2x128xf32> to vector<2x32xf32>
    %44 = vector.extract_strided_slice %40 {offsets = [0, 96], sizes = [2, 32], strides = [1, 1]} : vector<2x128xf32> to vector<2x32xf32>
    %45 = arith.mulf %41, %42 : vector<2x32xf32>
    %46 = arith.mulf %28, %43 : vector<2x32xf32>
    %47 = arith.addf %45, %46 : vector<2x32xf32>
    %48 = math.tanh %47 : vector<2x32xf32>
    %49 = arith.mulf %48, %44 : vector<2x32xf32>
    %c2_i32 = arith.constant 2 : i32
    %50 = arith.index_cast %c2_i32 : i32 to index
    %c0_24 = arith.constant 0 : index
    %c0_25 = arith.constant 0 : index
    %51 = vector.load %arg7[%50, %c0_24, %c0_25] : memref<8x2x128xf32, #tpu.memory_space<vmem>>, vector<1x2x128xf32>
    %52 = vector.shape_cast %51 : vector<1x2x128xf32> to vector<2x128xf32>
    %cst_26 = arith.constant dense<0.000000e+00> : vector<2x128xf32>
    %53 = tpu.matmul %49, %9, %cst_26 {dimension_numbers = #tpu.dot_dimension_numbers<[1], [0], [0], [1], [0, 0, 1, 1], [], []>} : vector<2x32xf32>, vector<32x128xf32>, vector<2x128xf32> -> vector<2x128xf32>
    %54 = arith.addf %52, %53 : vector<2x128xf32>
    %55 = math.tanh %54 : vector<2x128xf32>
    %cst_27 = arith.constant 5.000000e-01 : f32
    %56 = vector.broadcast %cst_27 : f32 to vector<2x128xf32>
    %57 = arith.mulf %56, %55 : vector<2x128xf32>
    %cst_28 = arith.constant 5.000000e-01 : f32
    %58 = vector.broadcast %cst_28 : f32 to vector<2x128xf32>
    %59 = arith.addf %57, %58 : vector<2x128xf32>
    %60 = vector.extract_strided_slice %55 {offsets = [0, 0], sizes = [2, 32], strides = [1, 1]} : vector<2x128xf32> to vector<2x32xf32>
    %61 = vector.extract_strided_slice %59 {offsets = [0, 32], sizes = [2, 32], strides = [1, 1]} : vector<2x128xf32> to vector<2x32xf32>
    %62 = vector.extract_strided_slice %59 {offsets = [0, 64], sizes = [2, 32], strides = [1, 1]} : vector<2x128xf32> to vector<2x32xf32>
    %63 = vector.extract_strided_slice %59 {offsets = [0, 96], sizes = [2, 32], strides = [1, 1]} : vector<2x128xf32> to vector<2x32xf32>
    %64 = arith.mulf %60, %61 : vector<2x32xf32>
    %65 = arith.mulf %47, %62 : vector<2x32xf32>
    %66 = arith.addf %64, %65 : vector<2x32xf32>
    %67 = math.tanh %66 : vector<2x32xf32>
    %68 = arith.mulf %67, %63 : vector<2x32xf32>
    %c3_i32 = arith.constant 3 : i32
    %69 = arith.index_cast %c3_i32 : i32 to index
    %c0_29 = arith.constant 0 : index
    %c0_30 = arith.constant 0 : index
    %70 = vector.load %arg7[%69, %c0_29, %c0_30] : memref<8x2x128xf32, #tpu.memory_space<vmem>>, vector<1x2x128xf32>
    %71 = vector.shape_cast %70 : vector<1x2x128xf32> to vector<2x128xf32>
    %cst_31 = arith.constant dense<0.000000e+00> : vector<2x128xf32>
    %72 = tpu.matmul %68, %9, %cst_31 {dimension_numbers = #tpu.dot_dimension_numbers<[1], [0], [0], [1], [0, 0, 1, 1], [], []>} : vector<2x32xf32>, vector<32x128xf32>, vector<2x128xf32> -> vector<2x128xf32>
    %73 = arith.addf %71, %72 : vector<2x128xf32>
    %74 = math.tanh %73 : vector<2x128xf32>
    %cst_32 = arith.constant 5.000000e-01 : f32
    %75 = vector.broadcast %cst_32 : f32 to vector<2x128xf32>
    %76 = arith.mulf %75, %74 : vector<2x128xf32>
    %cst_33 = arith.constant 5.000000e-01 : f32
    %77 = vector.broadcast %cst_33 : f32 to vector<2x128xf32>
    %78 = arith.addf %76, %77 : vector<2x128xf32>
    %79 = vector.extract_strided_slice %74 {offsets = [0, 0], sizes = [2, 32], strides = [1, 1]} : vector<2x128xf32> to vector<2x32xf32>
    %80 = vector.extract_strided_slice %78 {offsets = [0, 32], sizes = [2, 32], strides = [1, 1]} : vector<2x128xf32> to vector<2x32xf32>
    %81 = vector.extract_strided_slice %78 {offsets = [0, 64], sizes = [2, 32], strides = [1, 1]} : vector<2x128xf32> to vector<2x32xf32>
    %82 = vector.extract_strided_slice %78 {offsets = [0, 96], sizes = [2, 32], strides = [1, 1]} : vector<2x128xf32> to vector<2x32xf32>
    %83 = arith.mulf %79, %80 : vector<2x32xf32>
    %84 = arith.mulf %66, %81 : vector<2x32xf32>
    %85 = arith.addf %83, %84 : vector<2x32xf32>
    %86 = math.tanh %85 : vector<2x32xf32>
    %87 = arith.mulf %86, %82 : vector<2x32xf32>
    %c4_i32 = arith.constant 4 : i32
    %88 = arith.index_cast %c4_i32 : i32 to index
    %c0_34 = arith.constant 0 : index
    %c0_35 = arith.constant 0 : index
    %89 = vector.load %arg7[%88, %c0_34, %c0_35] : memref<8x2x128xf32, #tpu.memory_space<vmem>>, vector<1x2x128xf32>
    %90 = vector.shape_cast %89 : vector<1x2x128xf32> to vector<2x128xf32>
    %cst_36 = arith.constant dense<0.000000e+00> : vector<2x128xf32>
    %91 = tpu.matmul %87, %9, %cst_36 {dimension_numbers = #tpu.dot_dimension_numbers<[1], [0], [0], [1], [0, 0, 1, 1], [], []>} : vector<2x32xf32>, vector<32x128xf32>, vector<2x128xf32> -> vector<2x128xf32>
    %92 = arith.addf %90, %91 : vector<2x128xf32>
    %93 = math.tanh %92 : vector<2x128xf32>
    %cst_37 = arith.constant 5.000000e-01 : f32
    %94 = vector.broadcast %cst_37 : f32 to vector<2x128xf32>
    %95 = arith.mulf %94, %93 : vector<2x128xf32>
    %cst_38 = arith.constant 5.000000e-01 : f32
    %96 = vector.broadcast %cst_38 : f32 to vector<2x128xf32>
    %97 = arith.addf %95, %96 : vector<2x128xf32>
    %98 = vector.extract_strided_slice %93 {offsets = [0, 0], sizes = [2, 32], strides = [1, 1]} : vector<2x128xf32> to vector<2x32xf32>
    %99 = vector.extract_strided_slice %97 {offsets = [0, 32], sizes = [2, 32], strides = [1, 1]} : vector<2x128xf32> to vector<2x32xf32>
    %100 = vector.extract_strided_slice %97 {offsets = [0, 64], sizes = [2, 32], strides = [1, 1]} : vector<2x128xf32> to vector<2x32xf32>
    %101 = vector.extract_strided_slice %97 {offsets = [0, 96], sizes = [2, 32], strides = [1, 1]} : vector<2x128xf32> to vector<2x32xf32>
    %102 = arith.mulf %98, %99 : vector<2x32xf32>
    %103 = arith.mulf %85, %100 : vector<2x32xf32>
    %104 = arith.addf %102, %103 : vector<2x32xf32>
    %105 = math.tanh %104 : vector<2x32xf32>
    %106 = arith.mulf %105, %101 : vector<2x32xf32>
    %c5_i32 = arith.constant 5 : i32
    %107 = arith.index_cast %c5_i32 : i32 to index
    %c0_39 = arith.constant 0 : index
    %c0_40 = arith.constant 0 : index
    %108 = vector.load %arg7[%107, %c0_39, %c0_40] : memref<8x2x128xf32, #tpu.memory_space<vmem>>, vector<1x2x128xf32>
    %109 = vector.shape_cast %108 : vector<1x2x128xf32> to vector<2x128xf32>
    %cst_41 = arith.constant dense<0.000000e+00> : vector<2x128xf32>
    %110 = tpu.matmul %106, %9, %cst_41 {dimension_numbers = #tpu.dot_dimension_numbers<[1], [0], [0], [1], [0, 0, 1, 1], [], []>} : vector<2x32xf32>, vector<32x128xf32>, vector<2x128xf32> -> vector<2x128xf32>
    %111 = arith.addf %109, %110 : vector<2x128xf32>
    %112 = math.tanh %111 : vector<2x128xf32>
    %cst_42 = arith.constant 5.000000e-01 : f32
    %113 = vector.broadcast %cst_42 : f32 to vector<2x128xf32>
    %114 = arith.mulf %113, %112 : vector<2x128xf32>
    %cst_43 = arith.constant 5.000000e-01 : f32
    %115 = vector.broadcast %cst_43 : f32 to vector<2x128xf32>
    %116 = arith.addf %114, %115 : vector<2x128xf32>
    %117 = vector.extract_strided_slice %112 {offsets = [0, 0], sizes = [2, 32], strides = [1, 1]} : vector<2x128xf32> to vector<2x32xf32>
    %118 = vector.extract_strided_slice %116 {offsets = [0, 32], sizes = [2, 32], strides = [1, 1]} : vector<2x128xf32> to vector<2x32xf32>
    %119 = vector.extract_strided_slice %116 {offsets = [0, 64], sizes = [2, 32], strides = [1, 1]} : vector<2x128xf32> to vector<2x32xf32>
    %120 = vector.extract_strided_slice %116 {offsets = [0, 96], sizes = [2, 32], strides = [1, 1]} : vector<2x128xf32> to vector<2x32xf32>
    %121 = arith.mulf %117, %118 : vector<2x32xf32>
    %122 = arith.mulf %104, %119 : vector<2x32xf32>
    %123 = arith.addf %121, %122 : vector<2x32xf32>
    %124 = math.tanh %123 : vector<2x32xf32>
    %125 = arith.mulf %124, %120 : vector<2x32xf32>
    %c6_i32 = arith.constant 6 : i32
    %126 = arith.index_cast %c6_i32 : i32 to index
    %c0_44 = arith.constant 0 : index
    %c0_45 = arith.constant 0 : index
    %127 = vector.load %arg7[%126, %c0_44, %c0_45] : memref<8x2x128xf32, #tpu.memory_space<vmem>>, vector<1x2x128xf32>
    %128 = vector.shape_cast %127 : vector<1x2x128xf32> to vector<2x128xf32>
    %cst_46 = arith.constant dense<0.000000e+00> : vector<2x128xf32>
    %129 = tpu.matmul %125, %9, %cst_46 {dimension_numbers = #tpu.dot_dimension_numbers<[1], [0], [0], [1], [0, 0, 1, 1], [], []>} : vector<2x32xf32>, vector<32x128xf32>, vector<2x128xf32> -> vector<2x128xf32>
    %130 = arith.addf %128, %129 : vector<2x128xf32>
    %131 = math.tanh %130 : vector<2x128xf32>
    %cst_47 = arith.constant 5.000000e-01 : f32
    %132 = vector.broadcast %cst_47 : f32 to vector<2x128xf32>
    %133 = arith.mulf %132, %131 : vector<2x128xf32>
    %cst_48 = arith.constant 5.000000e-01 : f32
    %134 = vector.broadcast %cst_48 : f32 to vector<2x128xf32>
    %135 = arith.addf %133, %134 : vector<2x128xf32>
    %136 = vector.extract_strided_slice %131 {offsets = [0, 0], sizes = [2, 32], strides = [1, 1]} : vector<2x128xf32> to vector<2x32xf32>
    %137 = vector.extract_strided_slice %135 {offsets = [0, 32], sizes = [2, 32], strides = [1, 1]} : vector<2x128xf32> to vector<2x32xf32>
    %138 = vector.extract_strided_slice %135 {offsets = [0, 64], sizes = [2, 32], strides = [1, 1]} : vector<2x128xf32> to vector<2x32xf32>
    %139 = vector.extract_strided_slice %135 {offsets = [0, 96], sizes = [2, 32], strides = [1, 1]} : vector<2x128xf32> to vector<2x32xf32>
    %140 = arith.mulf %136, %137 : vector<2x32xf32>
    %141 = arith.mulf %123, %138 : vector<2x32xf32>
    %142 = arith.addf %140, %141 : vector<2x32xf32>
    %143 = math.tanh %142 : vector<2x32xf32>
    %144 = arith.mulf %143, %139 : vector<2x32xf32>
    %c7_i32 = arith.constant 7 : i32
    %145 = arith.index_cast %c7_i32 : i32 to index
    %c0_49 = arith.constant 0 : index
    %c0_50 = arith.constant 0 : index
    %146 = vector.load %arg7[%145, %c0_49, %c0_50] : memref<8x2x128xf32, #tpu.memory_space<vmem>>, vector<1x2x128xf32>
    %147 = vector.shape_cast %146 : vector<1x2x128xf32> to vector<2x128xf32>
    %cst_51 = arith.constant dense<0.000000e+00> : vector<2x128xf32>
    %148 = tpu.matmul %144, %9, %cst_51 {dimension_numbers = #tpu.dot_dimension_numbers<[1], [0], [0], [1], [0, 0, 1, 1], [], []>} : vector<2x32xf32>, vector<32x128xf32>, vector<2x128xf32> -> vector<2x128xf32>
    %149 = arith.addf %147, %148 : vector<2x128xf32>
    %150 = math.tanh %149 : vector<2x128xf32>
    %cst_52 = arith.constant 5.000000e-01 : f32
    %151 = vector.broadcast %cst_52 : f32 to vector<2x128xf32>
    %152 = arith.mulf %151, %150 : vector<2x128xf32>
    %cst_53 = arith.constant 5.000000e-01 : f32
    %153 = vector.broadcast %cst_53 : f32 to vector<2x128xf32>
    %154 = arith.addf %152, %153 : vector<2x128xf32>
    %155 = vector.extract_strided_slice %150 {offsets = [0, 0], sizes = [2, 32], strides = [1, 1]} : vector<2x128xf32> to vector<2x32xf32>
    %156 = vector.extract_strided_slice %154 {offsets = [0, 32], sizes = [2, 32], strides = [1, 1]} : vector<2x128xf32> to vector<2x32xf32>
    %157 = vector.extract_strided_slice %154 {offsets = [0, 64], sizes = [2, 32], strides = [1, 1]} : vector<2x128xf32> to vector<2x32xf32>
    %158 = vector.extract_strided_slice %154 {offsets = [0, 96], sizes = [2, 32], strides = [1, 1]} : vector<2x128xf32> to vector<2x32xf32>
    %159 = arith.mulf %155, %156 : vector<2x32xf32>
    %160 = arith.mulf %142, %157 : vector<2x32xf32>
    %161 = arith.addf %159, %160 : vector<2x32xf32>
    %162 = math.tanh %161 : vector<2x32xf32>
    %163 = arith.mulf %162, %158 : vector<2x32xf32>
    %c8_i32 = arith.constant 8 : i32
    %c0_54 = arith.constant 0 : index
    %c0_55 = arith.constant 0 : index
    %164 = vector.load %arg4[%c0_54, %c0_55] : memref<32x10xf32, #tpu.memory_space<vmem>>, vector<32x10xf32>
    %cst_56 = arith.constant dense<0.000000e+00> : vector<2x10xf32>
    %165 = tpu.matmul %163, %164, %cst_56 {dimension_numbers = #tpu.dot_dimension_numbers<[1], [0], [0], [1], [0, 0, 1, 1], [], []>} : vector<2x32xf32>, vector<32x10xf32>, vector<2x10xf32> -> vector<2x10xf32>
    %c0_57 = arith.constant 0 : index
    %c0_58 = arith.constant 0 : index
    %166 = vector.load %arg5[%c0_57, %c0_58] : memref<1x10xf32, #tpu.memory_space<vmem>>, vector<1x10xf32>
    %167 = vector.broadcast %166 : vector<1x10xf32> to vector<2x10xf32>
    %168 = arith.addf %165, %167 : vector<2x10xf32>
    %cst_59 = arith.constant dense<0xFF800000> : vector<2xf32>
    %169 = vector.multi_reduction <maximumf>, %168, %cst_59 [1] : vector<2x10xf32> to vector<2xf32>
    %170 = vector.shape_cast %169 : vector<2xf32> to vector<2x1xf32>
    %171 = vector.broadcast %170 : vector<2x1xf32> to vector<2x10xf32>
    %172 = arith.subf %168, %171 : vector<2x10xf32>
    %173 = math.exp %172 : vector<2x10xf32>
    %cst_60 = arith.constant dense<0.000000e+00> : vector<2xf32>
    %174 = vector.multi_reduction <add>, %173, %cst_60 [1] : vector<2x10xf32> to vector<2xf32>
    %175 = vector.shape_cast %174 : vector<2xf32> to vector<2x1xf32>
    %176 = tpu.reciprocal %175 {approx = true} : vector<2x1xf32> -> vector<2x1xf32>
    %177 = vector.broadcast %176 : vector<2x1xf32> to vector<2x10xf32>
    %178 = arith.mulf %173, %177 : vector<2x10xf32>
    %c0_61 = arith.constant 0 : index
    %c0_62 = arith.constant 0 : index
    %179 = vector.load %arg6[%c0_61, %c0_62] : memref<2x10xf32, #tpu.memory_space<vmem>>, vector<2x10xf32>
    tpu.vector_store %arg6[%c0_61, %c0_62], %178 {strides = array<i32>} : memref<2x10xf32, #tpu.memory_space<vmem>>, vector<2x10xf32>,
    return
  }
}

</mosaic_0001>

<bundles_post_ra>
// kernel: tpu_custom_call.1
= control target key start
LH: loop header
LB: loop body
LE: loop exit
PB: predicated region body
PF: predicated region fallthrough
CT: control target
= control target key end

     0   :  { %v1199_v1 = vmov 0.0   ;;  %vm1200_vm0 = vmmov 0   ;;  %v1201_v4 = vmov 0   ;;  %s1451_s0 = inlined_call_operand.vmem [shape: f32[8,2,1], index: 0, kind: input, shape index: {}]   ;;  %s1452_s1 = inlined_call_operand.vmem [shape: f32[1,1,128], index: 1, kind: input, shape index: {}]   ;;  %s1453_s2 = inlined_call_operand.vmem [shape: f32[32,128], index: 2, kind: input, shape index: {}]   ;;  %s1454_s3 = inlined_call_operand.vmem [shape: f32[1,1,128], index: 3, kind: input, shape index: {}]   ;;  %s1455_s4 = inlined_call_operand.vmem [shape: f32[32,10], index: 4, kind: input, shape index: {}]   ;;  %s1456_s5 = inlined_call_operand.vmem [shape: f32[1,10], index: 5, kind: input, shape index: {}]   ;;  %s1457_s6 = inlined_call_operand.hbm [shape: f32[2,10], index: 6, kind: output, shape index: {}]  }
   0x1   :  { %v1244_v0 = vld [vmem:[%s1453_s2 + $0x18] sm:$0xff]  ;;  %1034 = vmatprep.subr.mxu0 %v1199_v1  ;;  %v1250_v2 = vld [vmem:[%s1453_s2 + $0x10] sm:$0xff]  ;;  %1042 = vmatprep.mubr.msk.f32.mxu0 %vm1200_vm0, %v1199_v1  ;;  %v24_v3 = vld [vmem:[%s1451_s0] sm:$0x3] }
   0x2   :  { %1035 = vmatpush3.msra.mxu0 %v1244_v0  ;;  %1140 = vset.pattern.permute.xlu0 %v1201_v4 }
   0x3   :  { %11 = vsyncpa [#allocation4], 0  ;;  %1036 = vmatprep.subr.mxu0 %v1199_v1  ;;  %v1262_v5 = vld [vmem:[%s1453_s2 + $0x8] sm:$0xff]  ;;  %35 = vperm.xlu0 %1140, %v24_v3   ;;  %v1270_v6 = vld [vmem:[%s1453_s2] sm:$0xff]  ;;  %s1203_s11 = smov 64   ;;  %s1204_s12 = smov 32  }
   0x4   :  { %1037 = vmatpush3.msra.mxu0 %v1250_v2  ;;  %1045 = vmatprep.subr.mxu1 %v1199_v1  ;;  %v1300_v7 = vld [vmem:[%s1452_s1] ss:$0 sm:$0xff]  ;;  %s1202_s1 = smov 96   ;;  %v25_v20 = vld [vmem:[%s1451_s0 + $0x2] sm:$0x3]  ;;  %vm115_vm1 = vcmask 261120  }
   0x5   :  { %1038 = vmatprep.subr.mxu0 %v1199_v1  ;;  %1046 = vmatpush3.msra.mxu1 %v1244_v0  ;;  %v1305_v8 = vld [vmem:[%s1454_s3] ss:$0 sm:$0xff]  ;;  %v26_v38 = vld [vmem:[%s1451_s0 + $0x4] sm:$0x3]  ;;  %v27_v57 = vld [vmem:[%s1451_s0 + $0x6] sm:$0x3] }
   0x6   :  { %1039 = vmatpush3.msra.mxu0 %v1262_v5  ;;  %1047 = vmatprep.subr.mxu1 %v1199_v1  ;;  %vm951_vm2 = vcmask 74752  }
   0x7   :  { %1040 = vmatprep.subr.mxu0 %v1199_v1  ;;  %1048 = vmatpush3.msra.mxu1 %v1250_v2 }
   0x8   :  { %1041 = vmatpush3.msra.mxu0 %v1270_v6  ;;  %1049 = vmatprep.subr.mxu1 %v1199_v1 }
   0x9   :  { %1043 = vmatmul.mubr.f32.vlgmr.msra.gmra.mxu0 %v1199_v1  ;;  %1050 = vmatpush3.msra.mxu1 %v1262_v5 }
   0xa   :  { %1051 = vmatprep.subr.mxu1 %v1199_v1  ;;  %1053 = vmatprep.mubr.msk.f32.mxu1 %vm1200_vm0, %v1199_v1 }
   0xb   :  { %1052 = vmatpush3.msra.mxu1 %v1270_v6  ;;  %1056 = vmatprep.subr.mxu0 %v1199_v1 }
   0xc   :  { %1057 = vmatpush3.msra.mxu0 %v1244_v0  ;;  %1064 = vmatprep.mubr.msk.f32.mxu0 %vm1200_vm0, %v1199_v1 }
   0xd   :  { %1058 = vmatprep.subr.mxu0 %v1199_v1  ;;  %1067 = vmatprep.subr.mxu1 %v1199_v1 }
   0xe   :  { %1059 = vmatpush3.msra.mxu0 %v1250_v2 }
   0xf   :  { %1060 = vmatprep.subr.mxu0 %v1199_v1 }
  0x10   :  { %1061 = vmatpush3.msra.mxu0 %v1262_v5 }
  0x11   :  { %1062 = vmatprep.subr.mxu0 %v1199_v1 }
  0x12   :  { %1063 = vmatpush3.msra.mxu0 %v1270_v6 }
  0x13   :  { %1078 = vmatprep.subr.mxu0 %v1199_v1 }
  0x7e   :  { %v36_v9 = vpop.permute.xlu0 %35 }
  0x7f   :  { %v79_v10 = vmul.f32 %v1300_v7, %v36_v9 }
  0x81   :  { %v94_v11 = vadd.f32 %v1305_v8, %v79_v10 }
  0x83   :  { %102 = vst [vmem:[#allocation2] sm:$0x3] %v94_v11 }
  0x8a   :  { %v114_v12 = vld [vmem:[#allocation2] sm:$0x3] }
  0xc9   :  { %v185_v13 = vpop.f32.mrf.mxu0 }
  0xca   :  { %v189_v14 = vadd.f32 %v185_v13, %v114_v12 }
  0xcb   :  { %v1044_v15 = vpop.f32.mrf.mxu0 }
  0xcc   :  { %1141 = vtanh.f32 %v189_v14 }
  0xd9   :  { %v1142_v16 = vpop.eup %1141 }
  0xda   :  { %v191_v17 = vmul.f32 0.5, %v1142_v16 }
  0xdc   :  { %v192_v18 = vadd.f32 0.5, %v191_v17 }
  0xde   :  { %194 = vrot.lane.b32.xlu0 %v192_v18, %s1202_s1  ;;  %v198_v19 = vmul.f32 0.0, %v192_v18 }
  0xe0   :  { %200 = vrot.lane.b32.xlu1 %v198_v19, %s1203_s11  ;;  %v28_v19 = vld [vmem:[%s1451_s0 + $0x8] sm:$0x3] }
  0xe2   :  { %40 = vperm.xlu0 %1140, %v25_v20  }
  0xe4   :  { %205 = vrot.lane.b32.xlu1 %v192_v18, %s1204_s12 }
 0x150   :  { %v195_v21 = vpop.permute.xlu0 %194 }
 0x151   :  { %v197_v22 = vmul.f32 %v1142_v16, %v195_v21 }
 0x152   :  { %v201_v23 = vpop.permute.xlu1 %200 }
 0x153   :  { %v203_v24 = vadd.f32 %v201_v23, %v197_v22 }
 0x155   :  { %1143 = vtanh.f32 %v203_v24 }
 0x156   :  { %v206_v29 = vpop.permute.xlu1 %205 }
 0x15d   :  { %v41_v25 = vpop.permute.xlu0 %40 }
 0x15e   :  { %v80_v26 = vmul.f32 %v1300_v7, %v41_v25 }
 0x160   :  { %v95_v27 = vadd.f32 %v1305_v8, %v80_v26 }
 0x162   :  { %v1144_v28 = vpop.eup %1143  ;;  %103 = vst [vmem:[#allocation2 + $0x2] sm:$0x3] %v95_v27 }
 0x163   :  { %v208_v30 = vmul.f32 %v1144_v28, %v206_v29 }
 0x165   :  { %1054 = vmatmul.mubr.msk.f32.vlgmr.msra.gmra.mxu1 %vm115_vm1, %v208_v30 }
 0x166   :  { %1068 = vmatpush3.msra.mxu1 %v1244_v0  ;;  %1075 = vmatprep.mubr.msk.f32.mxu1 %vm1200_vm0, %v1199_v1 }
 0x167   :  { %1069 = vmatprep.subr.mxu1 %v1199_v1 }
 0x168   :  { %1070 = vmatpush3.msra.mxu1 %v1250_v2 }
 0x169   :  { %1071 = vmatprep.subr.mxu1 %v1199_v1  ;;  %v210_v31 = vld [vmem:[#allocation2 + $0x2] sm:$0x3] }
 0x16a   :  { %1072 = vmatpush3.msra.mxu1 %v1262_v5 }
 0x16b   :  { %1073 = vmatprep.subr.mxu1 %v1199_v1 }
 0x16c   :  { %1074 = vmatpush3.msra.mxu1 %v1270_v6 }
 0x16d   :  { %1089 = vmatprep.subr.mxu1 %v1199_v1 }
 0x225   :  { %v280_v32 = vpop.f32.mrf.mxu1 }
 0x226   :  { %v284_v33 = vadd.f32 %v280_v32, %v210_v31 }
 0x227   :  { %v1055_v34 = vpop.f32.mrf.mxu1 }
 0x228   :  { %1145 = vtanh.f32 %v284_v33 }
 0x235   :  { %v1146_v35 = vpop.eup %1145 }
 0x236   :  { %v286_v36 = vmul.f32 0.5, %v1146_v35 }
 0x238   :  { %v287_v37 = vadd.f32 0.5, %v286_v36 }
 0x23a   :  { %293 = vrot.lane.b32.xlu0 %v287_v37, %s1203_s11  ;;  %289 = vrot.lane.b32.xlu1 %v287_v37, %s1202_s1 }
 0x23e   :  { %45 = vperm.xlu0 %1140, %v26_v38   ;;  %299 = vrot.lane.b32.xlu1 %v287_v37, %s1204_s12  ;;  %v29_v38 = vld [vmem:[%s1451_s0 + $0xa] sm:$0x3] }
 0x2ac   :  { %v294_v39 = vpop.permute.xlu0 %293  ;;  %v290_v40 = vpop.permute.xlu1 %289 }
 0x2ad   :  { %v296_v41 = vmul.f32 %v294_v39, %v203_v24  ;;  %v292_v42 = vmul.f32 %v1146_v35, %v290_v40 }
 0x2af   :  { %v297_v43 = vadd.f32 %v296_v41, %v292_v42 }
 0x2b0   :  { %v300_v48 = vpop.permute.xlu1 %299 }
 0x2b1   :  { %1147 = vtanh.f32 %v297_v43 }
 0x2b9   :  { %v46_v44 = vpop.permute.xlu0 %45 }
 0x2ba   :  { %v81_v45 = vmul.f32 %v1300_v7, %v46_v44 }
 0x2bc   :  { %v96_v46 = vadd.f32 %v1305_v8, %v81_v45 }
 0x2be   :  { %v1148_v47 = vpop.eup %1147  ;;  %104 = vst [vmem:[#allocation2 + $0x4] sm:$0x3] %v96_v46 }
 0x2bf   :  { %v302_v49 = vmul.f32 %v1148_v47, %v300_v48 }
 0x2c1   :  { %1065 = vmatmul.mubr.msk.f32.vlgmr.msra.gmra.mxu0 %vm115_vm1, %v302_v49 }
 0x2c2   :  { %1079 = vmatpush3.msra.mxu0 %v1244_v0  ;;  %1086 = vmatprep.mubr.msk.f32.mxu0 %vm1200_vm0, %v1199_v1 }
 0x2c3   :  { %1080 = vmatprep.subr.mxu0 %v1199_v1 }
 0x2c4   :  { %1081 = vmatpush3.msra.mxu0 %v1250_v2 }
 0x2c5   :  { %1082 = vmatprep.subr.mxu0 %v1199_v1  ;;  %v304_v50 = vld [vmem:[#allocation2 + $0x4] sm:$0x3] }
 0x2c6   :  { %1083 = vmatpush3.msra.mxu0 %v1262_v5 }
 0x2c7   :  { %1084 = vmatprep.subr.mxu0 %v1199_v1 }
 0x2c8   :  { %1085 = vmatpush3.msra.mxu0 %v1270_v6 }
 0x2c9   :  { %1100 = vmatprep.subr.mxu0 %v1199_v1 }
 0x381   :  { %v374_v51 = vpop.f32.mrf.mxu0 }
 0x382   :  { %v378_v52 = vadd.f32 %v374_v51, %v304_v50 }
 0x383   :  { %v1066_v53 = vpop.f32.mrf.mxu0 }
 0x384   :  { %1149 = vtanh.f32 %v378_v52 }
 0x391   :  { %v1150_v54 = vpop.eup %1149 }
 0x392   :  { %v380_v55 = vmul.f32 0.5, %v1150_v54 }
 0x394   :  { %v381_v56 = vadd.f32 0.5, %v380_v55 }
 0x396   :  { %387 = vrot.lane.b32.xlu0 %v381_v56, %s1203_s11  ;;  %383 = vrot.lane.b32.xlu1 %v381_v56, %s1202_s1 }
 0x39a   :  { %50 = vperm.xlu0 %1140, %v27_v57   ;;  %393 = vrot.lane.b32.xlu1 %v381_v56, %s1204_s12 }
 0x408   :  { %v388_v58 = vpop.permute.xlu0 %387  ;;  %v384_v59 = vpop.permute.xlu1 %383 }
 0x409   :  { %v390_v60 = vmul.f32 %v388_v58, %v297_v43  ;;  %v386_v61 = vmul.f32 %v1150_v54, %v384_v59 }
 0x40b   :  { %v391_v62 = vadd.f32 %v390_v60, %v386_v61 }
 0x40c   :  { %v394_v10 = vpop.permute.xlu1 %393 }
 0x40d   :  { %1151 = vtanh.f32 %v391_v62 }
 0x415   :  { %v51_v63 = vpop.permute.xlu0 %50 }
 0x416   :  { %v82_v3 = vmul.f32 %v1300_v7, %v51_v63 }
 0x418   :  { %v97_v4 = vadd.f32 %v1305_v8, %v82_v3 }
 0x41a   :  { %v1152_v9 = vpop.eup %1151  ;;  %105 = vst [vmem:[#allocation2 + $0x6] sm:$0x3] %v97_v4 }
 0x41b   :  { %v396_v11 = vmul.f32 %v1152_v9, %v394_v10 }
 0x41d   :  { %1076 = vmatmul.mubr.msk.f32.vlgmr.msra.gmra.mxu1 %vm115_vm1, %v396_v11 }
 0x41e   :  { %1090 = vmatpush3.msra.mxu1 %v1244_v0  ;;  %1097 = vmatprep.mubr.msk.f32.mxu1 %vm1200_vm0, %v1199_v1 }
 0x41f   :  { %1091 = vmatprep.subr.mxu1 %v1199_v1 }
 0x420   :  { %1092 = vmatpush3.msra.mxu1 %v1250_v2 }
 0x421   :  { %1093 = vmatprep.subr.mxu1 %v1199_v1  ;;  %v398_v12 = vld [vmem:[#allocation2 + $0x6] sm:$0x3] }
 0x422   :  { %1094 = vmatpush3.msra.mxu1 %v1262_v5 }
 0x423   :  { %1095 = vmatprep.subr.mxu1 %v1199_v1 }
 0x424   :  { %1096 = vmatpush3.msra.mxu1 %v1270_v6 }
 0x425   :  { %1111 = vmatprep.subr.mxu1 %v1199_v1 }
 0x4dd   :  { %v468_v13 = vpop.f32.mrf.mxu1 }
 0x4de   :  { %v472_v14 = vadd.f32 %v468_v13, %v398_v12 }
 0x4df   :  { %v1077_v15 = vpop.f32.mrf.mxu1 }
 0x4e0   :  { %1153 = vtanh.f32 %v472_v14  ;;  %v31_v15 = vld [vmem:[%s1451_s0 + $0xe] sm:$0x3] }
 0x4ed   :  { %v1154_v16 = vpop.eup %1153 }
 0x4ee   :  { %v474_v17 = vmul.f32 0.5, %v1154_v16 }
 0x4f0   :  { %v475_v18 = vadd.f32 0.5, %v474_v17 }
 0x4f2   :  { %481 = vrot.lane.b32.xlu0 %v475_v18, %s1203_s11  ;;  %477 = vrot.lane.b32.xlu1 %v475_v18, %s1202_s1 }
 0x4f6   :  { %55 = vperm.xlu0 %1140, %v28_v19   ;;  %487 = vrot.lane.b32.xlu1 %v475_v18, %s1204_s12 }
 0x564   :  { %v482_v20 = vpop.permute.xlu0 %481  ;;  %v478_v21 = vpop.permute.xlu1 %477 }
 0x565   :  { %v484_v22 = vmul.f32 %v482_v20, %v391_v62  ;;  %v480_v23 = vmul.f32 %v1154_v16, %v478_v21 }
 0x567   :  { %v485_v24 = vadd.f32 %v484_v22, %v480_v23 }
 0x568   :  { %v488_v29 = vpop.permute.xlu1 %487 }
 0x569   :  { %1155 = vtanh.f32 %v485_v24 }
 0x571   :  { %v56_v25 = vpop.permute.xlu0 %55 }
 0x572   :  { %v83_v26 = vmul.f32 %v1300_v7, %v56_v25 }
 0x574   :  { %v98_v27 = vadd.f32 %v1305_v8, %v83_v26 }
 0x576   :  { %v1156_v28 = vpop.eup %1155  ;;  %106 = vst [vmem:[#allocation2 + $0x8] sm:$0x3] %v98_v27 }
 0x577   :  { %v490_v30 = vmul.f32 %v1156_v28, %v488_v29 }
 0x579   :  { %1087 = vmatmul.mubr.msk.f32.vlgmr.msra.gmra.mxu0 %vm115_vm1, %v490_v30 }
 0x57a   :  { %1101 = vmatpush3.msra.mxu0 %v1244_v0  ;;  %1108 = vmatprep.mubr.msk.f32.mxu0 %vm1200_vm0, %v1199_v1 }
 0x57b   :  { %1102 = vmatprep.subr.mxu0 %v1199_v1 }
 0x57c   :  { %1103 = vmatpush3.msra.mxu0 %v1250_v2 }
 0x57d   :  { %1104 = vmatprep.subr.mxu0 %v1199_v1  ;;  %v492_v31 = vld [vmem:[#allocation2 + $0x8] sm:$0x3] }
 0x57e   :  { %1105 = vmatpush3.msra.mxu0 %v1262_v5 }
 0x57f   :  { %1106 = vmatprep.subr.mxu0 %v1199_v1 }
 0x580   :  { %1107 = vmatpush3.msra.mxu0 %v1270_v6 }
 0x581   :  { %1122 = vmatprep.subr.mxu0 %v1199_v1 }
 0x639   :  { %v562_v32 = vpop.f32.mrf.mxu0 }
 0x63a   :  { %v566_v33 = vadd.f32 %v562_v32, %v492_v31 }
 0x63b   :  { %v1088_v34 = vpop.f32.mrf.mxu0 }
 0x63c   :  { %1157 = vtanh.f32 %v566_v33  ;;  %v868_v34 = vld [vmem:[%s1455_s4 + $0x8] sm:$0xff] }
 0x649   :  { %v1158_v35 = vpop.eup %1157 }
 0x64a   :  { %v568_v36 = vmul.f32 0.5, %v1158_v35 }
 0x64c   :  { %v569_v37 = vadd.f32 0.5, %v568_v36 }
 0x64e   :  { %575 = vrot.lane.b32.xlu0 %v569_v37, %s1203_s11  ;;  %571 = vrot.lane.b32.xlu1 %v569_v37, %s1202_s1 }
 0x652   :  { %60 = vperm.xlu0 %1140, %v29_v38   ;;  %581 = vrot.lane.b32.xlu1 %v569_v37, %s1204_s12 }
 0x6c0   :  { %v576_v39 = vpop.permute.xlu0 %575  ;;  %v572_v40 = vpop.permute.xlu1 %571 }
 0x6c1   :  { %v578_v41 = vmul.f32 %v576_v39, %v485_v24  ;;  %v574_v42 = vmul.f32 %v1158_v35, %v572_v40  ;;  %v867_v35 = vld [vmem:[%s1455_s4] sm:$0xff] }
 0x6c3   :  { %v579_v43 = vadd.f32 %v578_v41, %v574_v42 }
 0x6c4   :  { %v582_v48 = vpop.permute.xlu1 %581 }
 0x6c5   :  { %1159 = vtanh.f32 %v579_v43 }
 0x6cd   :  { %v61_v44 = vpop.permute.xlu0 %60 }
 0x6ce   :  { %v84_v45 = vmul.f32 %v1300_v7, %v61_v44  ;;  %v987_v44 = vld [vmem:[%s1456_s5] ss:$0 sm:$0xff] }
 0x6d0   :  { %v99_v46 = vadd.f32 %v1305_v8, %v84_v45 }
 0x6d2   :  { %v1160_v47 = vpop.eup %1159  ;;  %107 = vst [vmem:[#allocation2 + $0xa] sm:$0x3] %v99_v46 }
 0x6d3   :  { %v584_v49 = vmul.f32 %v1160_v47, %v582_v48 }
 0x6d5   :  { %1098 = vmatmul.mubr.msk.f32.vlgmr.msra.gmra.mxu1 %vm115_vm1, %v584_v49 }
 0x6d6   :  { %1112 = vmatpush3.msra.mxu1 %v1244_v0  ;;  %1119 = vmatprep.mubr.msk.f32.mxu1 %vm1200_vm0, %v1199_v1 }
 0x6d7   :  { %1113 = vmatprep.subr.mxu1 %v1199_v1 }
 0x6d8   :  { %1114 = vmatpush3.msra.mxu1 %v1250_v2  ;;  %v30_v2 = vld [vmem:[%s1451_s0 + $0xc] sm:$0x3] }
 0x6d9   :  { %1115 = vmatprep.subr.mxu1 %v1199_v1  ;;  %v586_v50 = vld [vmem:[#allocation2 + $0xa] sm:$0x3] }
 0x6da   :  { %1116 = vmatpush3.msra.mxu1 %v1262_v5 }
 0x6db   :  { %1117 = vmatprep.subr.mxu1 %v1199_v1 }
 0x6dc   :  { %1118 = vmatpush3.msra.mxu1 %v1270_v6 }
 0x795   :  { %v656_v51 = vpop.f32.mrf.mxu1 }
 0x796   :  { %v660_v52 = vadd.f32 %v656_v51, %v586_v50 }
 0x797   :  { %v1099_v53 = vpop.f32.mrf.mxu1 }
 0x798   :  { %1161 = vtanh.f32 %v660_v52 }
 0x7a5   :  { %v1162_v0 = vpop.eup %1161 }
 0x7a6   :  { %v662_v54 = vmul.f32 0.5, %v1162_v0 }
 0x7a8   :  { %v663_v55 = vadd.f32 0.5, %v662_v54 }
 0x7aa   :  { %669 = vrot.lane.b32.xlu0 %v663_v55, %s1203_s11  ;;  %665 = vrot.lane.b32.xlu1 %v663_v55, %s1202_s1 }
 0x7ae   :  { %65 = vperm.xlu0 %1140, %v30_v2   ;;  %675 = vrot.lane.b32.xlu1 %v663_v55, %s1204_s12 }
 0x81c   :  { %v670_v5 = vpop.permute.xlu0 %669  ;;  %v666_v6 = vpop.permute.xlu1 %665 }
 0x81d   :  { %v672_v56 = vmul.f32 %v670_v5, %v579_v43  ;;  %v668_v57 = vmul.f32 %v1162_v0, %v666_v6 }
 0x81f   :  { %v673_v58 = vadd.f32 %v672_v56, %v668_v57 }
 0x820   :  { %v676_v63 = vpop.permute.xlu1 %675 }
 0x821   :  { %1163 = vtanh.f32 %v673_v58 }
 0x829   :  { %v66_v59 = vpop.permute.xlu0 %65 }
 0x82a   :  { %v85_v60 = vmul.f32 %v1300_v7, %v66_v59 }
 0x82c   :  { %v100_v61 = vadd.f32 %v1305_v8, %v85_v60 }
 0x82e   :  { %v1164_v62 = vpop.eup %1163  ;;  %108 = vst [vmem:[#allocation2 + $0xc] sm:$0x3] %v100_v61 }
 0x82f   :  { %v678_v3 = vmul.f32 %v1164_v62, %v676_v63 }
 0x831   :  { %1109 = vmatmul.mubr.msk.f32.vlgmr.msra.gmra.mxu0 %vm115_vm1, %v678_v3 }
 0x832   :  { %1130 = vmatprep.mubr.msk.f32.mxu0 %vm1200_vm0, %v1199_v1 }
 0x835   :  { %v680_v4 = vld [vmem:[#allocation2 + $0xc] sm:$0x3] }
 0x8f1   :  { %v750_v9 = vpop.f32.mrf.mxu0 }
 0x8f2   :  { %v754_v10 = vadd.f32 %v750_v9, %v680_v4 }
 0x8f3   :  { %v1110_v11 = vpop.f32.mrf.mxu0 }
 0x8f4   :  { %1165 = vtanh.f32 %v754_v10 }
 0x901   :  { %v1166_v12 = vpop.eup %1165 }
 0x902   :  { %v756_v13 = vmul.f32 0.5, %v1166_v12 }
 0x904   :  { %v757_v14 = vadd.f32 0.5, %v756_v13 }
 0x906   :  { %763 = vrot.lane.b32.xlu0 %v757_v14, %s1203_s11  ;;  %759 = vrot.lane.b32.xlu1 %v757_v14, %s1202_s1 }
 0x90a   :  { %70 = vperm.xlu0 %1140, %v31_v15   ;;  %769 = vrot.lane.b32.xlu1 %v757_v14, %s1204_s12 }
 0x978   :  { %v764_v16 = vpop.permute.xlu0 %763  ;;  %v760_v17 = vpop.permute.xlu1 %759 }
 0x979   :  { %v766_v18 = vmul.f32 %v764_v16, %v673_v58  ;;  %v762_v19 = vmul.f32 %v1166_v12, %v760_v17 }
 0x97b   :  { %v767_v20 = vadd.f32 %v766_v18, %v762_v19 }
 0x97c   :  { %v770_v25 = vpop.permute.xlu1 %769 }
 0x97d   :  { %1167 = vtanh.f32 %v767_v20 }
 0x985   :  { %v71_v21 = vpop.permute.xlu0 %70 }
 0x986   :  { %v86_v22 = vmul.f32 %v1300_v7, %v71_v21  ;;  %v870_v7 = vld [vmem:[%s1455_s4 + $0x18] sm:$0xff] }
 0x987   :  { %1123 = vmatpush3.msra.mxu0 %v870_v7 }
 0x988   :  { %v101_v23 = vadd.f32 %v1305_v8, %v86_v22  ;;  %v869_v8 = vld [vmem:[%s1455_s4 + $0x10] sm:$0xff]  ;;  %1124 = vmatprep.subr.mxu0 %v1199_v1  ;;  %s1205_s4 = smov [#allocation3]  }
 0x989   :  { %1125 = vmatpush3.msra.mxu0 %v869_v8  ;;  %s970_s9 = sshll.u32 %s1205_s4, 4  ;;  %s971_s9 = int_to_ptr.vmem [resolvable:$true] %s970_s9 }
 0x98a   :  { %v1168_v24 = vpop.eup %1167  ;;  %109 = vst [vmem:[#allocation2 + $0xe] sm:$0x3] %v101_v23  ;;  %1126 = vmatprep.subr.mxu0 %v1199_v1  ;;  %s1177_s5 = scalar_lea.vmem %s971_s9, 32  ;;  %p1182_p1 = scmp.lt.s32.totalorder %s971_s9, %s971_s9 }
 0x98b   :  { %v772_v26 = vmul.f32 %v1168_v24, %v770_v25  ;;  %1127 = vmatpush3.msra.mxu0 %v868_v34  ;;  %p1178_p0 = scmp.ne.s32.totalorder %s971_s9, %s1177_s5  ;;  %p1183_p2 = scmp.lt.s32.totalorder %s1177_s5, %s1177_s5 }
 0x98c   :  { %1128 = vmatprep.subr.mxu0 %v1199_v1 }
 0x98d   :  { %1120 = vmatmul.mubr.msk.f32.vlgmr.msra.gmra.mxu1 %vm115_vm1, %v772_v26  ;;  %1129 = vmatpush3.msra.mxu0 %v867_v35  ;;  %p1184_p3 = por %p1183_p2, %p1182_p1 }
 0x98f   :  { %p1185_p4 = pnand %p1184_p3, %p1178_p0 }
 0x991   :  { %v774_v27 = vld [vmem:[#allocation2 + $0xe] sm:$0x3] }
 0xa4d   :  { %v844_v28 = vpop.f32.mrf.mxu1 }
 0xa4e   :  { %v848_v29 = vadd.f32 %v844_v28, %v774_v27 }
 0xa4f   :  { %v1121_v30 = vpop.f32.mrf.mxu1 }
 0xa50   :  { %1169 = vtanh.f32 %v848_v29 }
 0xa5d   :  { %v1170_v31 = vpop.eup %1169 }
 0xa5e   :  { %v850_v32 = vmul.f32 0.5, %v1170_v31 }
 0xa60   :  { %v851_v33 = vadd.f32 0.5, %v850_v32 }
 0xa62   :  { %857 = vrot.lane.b32.xlu0 %v851_v33, %s1203_s11  ;;  %853 = vrot.lane.b32.xlu1 %v851_v33, %s1202_s1 }
 0xa66   :  { %863 = vrot.lane.b32.xlu1 %v851_v33, %s1204_s12 }
 0xad4   :  { %v858_v36 = vpop.permute.xlu0 %857  ;;  %v854_v37 = vpop.permute.xlu1 %853 }
 0xad5   :  { %v860_v38 = vmul.f32 %v858_v36, %v767_v20  ;;  %v856_v39 = vmul.f32 %v1170_v31, %v854_v37 }
 0xad7   :  { %v861_v40 = vadd.f32 %v860_v38, %v856_v39 }
 0xad8   :  { %v864_v42 = vpop.permute.xlu1 %863 }
 0xad9   :  { %1171 = vtanh.f32 %v861_v40 }
 0xae6   :  { %v1172_v41 = vpop.eup %1171 }
 0xae7   :  { %v866_v43 = vmul.f32 %v1172_v41, %v864_v42 }
 0xae9   :  { %1131 = vmatmul.mubr.msk.f32.vlgmr.msra.gmra.mxu0 %vm115_vm1, %v866_v43 }
 0xba9   :  { %v947_v45 = vpop.f32.mrf.mxu0 }
 0xbaa   :  { %v948_v46 = vadd.f32 %v987_v44, %v947_v45 }
 0xbab   :  { %v1132_v1 = vpop.f32.mrf.mxu0 }
 0xbac   :  { %v952_v47 = vsel %vm951_vm2, %v948_v46, -inf }
 0xbad   :  { %953 = vmax.xlane.f32.xlu0 %v952_v47 }
 0xc36   :  { %v954_v48 = vpop.xlane.xlu0 %953 }
 0xc37   :  { %v955_v49 = vsub.f32 %v948_v46, %v954_v48 }
 0xc39   :  { %v956_v50 = vmul.f32 1.442695, %v955_v49 }
 0xc3b   :  { %1173 = vpow2.f32 %v956_v50 }
 0xc48   :  { %v1174_v51 = vpop.eup %1173 }
 0xc49   :  { %v958_v52 = vsel %vm951_vm2, %v1174_v51, 0.0 }
 0xc4a   :  { %959 = vadd.xlane.f32.xlu1 %v958_v52 }
 0xcd3   :  { %v960_v53 = vpop.xlane.xlu1 %959 }
 0xcd4   :  { %1175 = vrcp.f32 %v960_v53 }
 0xce1   :  { %v1176_v0 = vpop.eup %1175 }
 0xce2   :  { %v962_v54 = vmul.f32 %v1176_v0, %v1174_v51 }
 0xce4   :  { %963 = vst.msk [vmem:[#allocation3] sm:$0x3] %vm951_vm2, %v962_v54 }
 0xce5   :  { %1188 = shalt.err (!%p1185_p4)
}
 0xce6   :  { %973 = dma.vmem_to_hbm [thread:$0]  %s971_s9, 32, %s1457_s6, [#allocation4]  }
 0xce7   :  { %1197 = dma.done.wait [#allocation4], 32  }
 0xce8   :  { %1198 = vsyncadd [#allocation4], 4294967264 }
 0xce9   :  { %977 = vsyncpa [#allocation4], 1 }

</bundles_post_ra>
